<compile_context>
chip_gen: v7x
topology: tpu7x:2x2x1
jax: 0.10.0
libtpu: 0.0.40
codegen_flags: <defaults>
</compile_context>

<pallas_src>
import jax
import jax.numpy as jnp
from jax.experimental import pallas as pl
from jax.experimental.pallas import tpu as pltpu


def _logistic_kernel(x_ref, w_ref, b_ref, o_ref):
    # x_ref: (TILE_B, D) native dtype
    # w_ref: (O_pad, D)  native dtype  (PyTorch layout, NOT transposed)
    # b_ref: (1, O_pad)  f32, padded columns are -inf
    # o_ref: (TILE_B, O_pad)
    x = x_ref[...]
    w = w_ref[...]

    # x @ W^T on the MXU with f32 accumulation (contract last dim of both).
    logits = jax.lax.dot_general(
        x, w, (((1,), (1,)), ((), ())),
        preferred_element_type=jnp.float32) + b_ref[...]

    # Numerically stable softmax over the (padded) class axis.
    # Padded columns carry -inf bias -> exp(-inf - m) == 0, so they contribute
    # nothing to the sum and the result matches the unpadded softmax exactly.
    m = jnp.max(logits, axis=1, keepdims=True)
    e = jnp.exp(logits - m)
    s = jnp.sum(e, axis=1, keepdims=True)
    o_ref[...] = (e * pl.reciprocal(s, approx=True)).astype(o_ref.dtype)


def logistic_model_forward(x, weight, bias, *, tile_b=256):
    """x: (B, ...) any trailing shape; weight: (output_dim, input_dim) PyTorch
    layout; bias: (output_dim,). Returns softmax(x_flat @ W^T + b), (B, O)."""
    B = x.shape[0]
    x_flat = x.reshape(B, -1)                      # HL.flatten_input_data
    D = x_flat.shape[1]
    O = weight.shape[0]
    assert weight.shape == (O, D)

    # ---- Lane-dense output: pad class axis up to a multiple of 128. ----
    O_pad = ((O + 127) // 128) * 128
    w_pad = jnp.pad(weight, ((0, O_pad - O), (0, 0)))                 # zeros
    b_pad = jnp.pad(bias.astype(jnp.float32), (0, O_pad - O),
                    constant_values=-jnp.inf).reshape(1, O_pad)       # -inf

    # ---- Batch tiling: D whole, B tiled (weight/bias stay VMEM-resident). ----
    if B <= tile_b:
        TILE_B = B                                  # single block == full dim
        B_pad = B
    else:
        TILE_B = tile_b                             # multiple of 8 (and 256)
        B_pad = ((B + TILE_B - 1) // TILE_B) * TILE_B
        if B_pad != B:
            x_flat = jnp.pad(x_flat, ((0, B_pad - B), (0, 0)))
    grid = (B_pad // TILE_B,)

    out = pl.pallas_call(
        _logistic_kernel,
        out_shape=jax.ShapeDtypeStruct((B_pad, O_pad), x_flat.dtype),
        grid_spec=pltpu.PrefetchScalarGridSpec(
            num_scalar_prefetch=0,
            grid=grid,
            in_specs=[
                pl.BlockSpec((TILE_B, D), lambda i: (i, 0)),   # x: tiled over B
                pl.BlockSpec((O_pad, D), lambda i: (0, 0)),    # W: resident
                pl.BlockSpec((1, O_pad), lambda i: (0, 0)),    # b: resident
            ],
            out_specs=pl.BlockSpec((TILE_B, O_pad), lambda i: (i, 0)),
        ),
        compiler_params=pltpu.CompilerParams(
            dimension_semantics=("parallel",)),
    )(x_flat, w_pad, b_pad)

    return out[:B, :O]


if __name__ == "__main__":
    # Small shapes consistent with the module: flatten (2, 4, 8, 8) -> 256,
    # output_dim = 16 classes.
    key = jax.random.PRNGKey(0)
    kx, kw, kb = jax.random.split(key, 3)

    B, C, H, W = 2, 4, 8, 8
    input_dim = C * H * W
    output_dim = 16

    x = jax.random.normal(kx, (B, C, H, W), dtype=jnp.float32)

    # Deterministic nn.Linear-style init: U(-1/sqrt(in), 1/sqrt(in)).
    bound = 1.0 / jnp.sqrt(jnp.float32(input_dim))
    weight = jax.random.uniform(kw, (output_dim, input_dim), jnp.float32, -bound, bound)
    bias = jax.random.uniform(kb, (output_dim,), jnp.float32, -bound, bound)

    out = logistic_model_forward(x, weight, bias)
    out = jax.block_until_ready(out)

    # Sanity checks (tolerances account for approx reciprocal in the kernel).
    ref = jax.nn.softmax(x.reshape(B, -1) @ weight.T + bias, axis=1)
    assert out.shape == (B, output_dim)
    assert jnp.allclose(jnp.sum(out, axis=1), 1.0, atol=1e-2)
    assert jnp.allclose(out, ref, atol=2e-3)

    print("KERNEL_OK")
</pallas_src>

<mosaic_0001>
module attributes {stable_mosaic.version = 11 : i64} {
  func.func @_logistic_kernel(%arg0: i32, %arg1: memref<2x256xf32, #tpu.memory_space<vmem>>, %arg2: memref<128x256xf32, #tpu.memory_space<vmem>>, %arg3: memref<1x128xf32, #tpu.memory_space<vmem>>, %arg4: memref<2x128xf32, #tpu.memory_space<vmem>>) attributes {dimension_semantics = [#tpu.dimension_semantics<parallel>], iteration_bounds = array<i64: 1>, scalar_prefetch = 0 : i64, scratch_operands = 0 : i64, tpu.core_type = #tpu.core_type<tc>, window_params = [{transform_indices = @transform_0, window_bounds = array<i64: 2, 256>}, {pipeline_mode = #tpu.pipeline_mode<synchronous>, transform_indices = @transform_1, window_bounds = array<i64: 128, 256>}, {pipeline_mode = #tpu.pipeline_mode<synchronous>, transform_indices = @transform_2, window_bounds = array<i64: 1, 128>}, {transform_indices = @transform_3, window_bounds = array<i64: 2, 128>}]} {
    %c0 = arith.constant 0 : index
    %c0_0 = arith.constant 0 : index
    %0 = vector.load %arg1[%c0, %c0_0] : memref<2x256xf32, #tpu.memory_space<vmem>>, vector<2x256xf32>
    %c0_1 = arith.constant 0 : index
    %c0_2 = arith.constant 0 : index
    %1 = vector.load %arg2[%c0_1, %c0_2] : memref<128x256xf32, #tpu.memory_space<vmem>>, vector<128x256xf32>
    %cst = arith.constant dense<0.000000e+00> : vector<2x128xf32>
    %2 = tpu.matmul %0, %1, %cst {dimension_numbers = #tpu.dot_dimension_numbers<[1], [1], [0], [0], [0, 0, 1, 0], [], []>} : vector<2x256xf32>, vector<128x256xf32>, vector<2x128xf32> -> vector<2x128xf32>
    %c0_3 = arith.constant 0 : index
    %c0_4 = arith.constant 0 : index
    %3 = vector.load %arg3[%c0_3, %c0_4] : memref<1x128xf32, #tpu.memory_space<vmem>>, vector<1x128xf32>
    %4 = vector.broadcast %3 : vector<1x128xf32> to vector<2x128xf32>
    %5 = arith.addf %2, %4 : vector<2x128xf32>
    %cst_5 = arith.constant dense<0xFF800000> : vector<2xf32>
    %6 = vector.multi_reduction <maximumf>, %5, %cst_5 [1] : vector<2x128xf32> to vector<2xf32>
    %7 = vector.shape_cast %6 : vector<2xf32> to vector<2x1xf32>
    %8 = vector.broadcast %7 : vector<2x1xf32> to vector<2x128xf32>
    %9 = arith.subf %5, %8 : vector<2x128xf32>
    %10 = math.exp %9 : vector<2x128xf32>
    %cst_6 = arith.constant dense<0.000000e+00> : vector<2xf32>
    %11 = vector.multi_reduction <add>, %10, %cst_6 [1] : vector<2x128xf32> to vector<2xf32>
    %12 = vector.shape_cast %11 : vector<2xf32> to vector<2x1xf32>
    %13 = tpu.reciprocal %12 {approx = true} : vector<2x1xf32> -> vector<2x1xf32>
    %14 = vector.broadcast %13 : vector<2x1xf32> to vector<2x128xf32>
    %15 = arith.mulf %10, %14 : vector<2x128xf32>
    %c0_7 = arith.constant 0 : index
    %c0_8 = arith.constant 0 : index
    %16 = vector.load %arg4[%c0_7, %c0_8] : memref<2x128xf32, #tpu.memory_space<vmem>>, vector<2x128xf32>
    tpu.vector_store %arg4[%c0_7, %c0_8], %15 {strides = array<i32>} : memref<2x128xf32, #tpu.memory_space<vmem>>, vector<2x128xf32>,
    return
  }
  func.func @transform_0(%arg0: i32) -> (i32, i32) {
    %c0_i32 = arith.constant 0 : i32
    %c0_i32_0 = arith.constant 0 : i32
    return %arg0, %c0_i32 : i32, i32
  }
  func.func @transform_1(%arg0: i32) -> (i32, i32) {
    %c0_i32 = arith.constant 0 : i32
    %c0_i32_0 = arith.constant 0 : i32
    %c0_i32_1 = arith.constant 0 : i32
    return %c0_i32, %c0_i32_0 : i32, i32
  }
  func.func @transform_2(%arg0: i32) -> (i32, i32) {
    %c0_i32 = arith.constant 0 : i32
    %c0_i32_0 = arith.constant 0 : i32
    %c0_i32_1 = arith.constant 0 : i32
    return %c0_i32, %c0_i32_0 : i32, i32
  }
  func.func @transform_3(%arg0: i32) -> (i32, i32) {
    %c0_i32 = arith.constant 0 : i32
    %c0_i32_0 = arith.constant 0 : i32
    return %arg0, %c0_i32 : i32, i32
  }
}

</mosaic_0001>

<bundles_post_ra>
// kernel: tpu_custom_call.1
= control target key start
LH: loop header
LB: loop body
LE: loop exit
PB: predicated region body
PF: predicated region fallthrough
CT: control target
= control target key end

     0   :  { %8 = vsyncpa [#allocation3], 0  ;;  %s377_s0 = inlined_call_operand.hbm [shape: f32[2,256], index: 0, kind: input, shape index: {}]   ;;  %s378_s1 = inlined_call_operand.hbm [shape: f32[128,256], index: 1, kind: input, shape index: {}]   ;;  %s379_s2 = inlined_call_operand.vmem [shape: f32[1,128], index: 2, kind: input, shape index: {}]   ;;  %s380_s3 = inlined_call_operand.hbm [shape: f32[2,128], index: 3, kind: output, shape index: {}]  }
   0x1   :  { %9 = vsyncpa [#allocation6], 0 }
   0x2   :  { %10 = vsyncpa [#allocation4], 0  ;;  %s306_s12 = smov [#allocation2]   ;;  %s307_s14 = smov [#allocation5]  }
   0x3   :  { %s17_s13 = sshll.u32 %s306_s12, 4  ;;  %s26_s15 = sshll.u32 %s307_s14, 4  ;;  %s18_s13 = int_to_ptr.vmem [resolvable:$true] %s17_s13  ;;  %s331_s15 = int_to_ptr.vmem [resolvable:$true] %s26_s15 }
   0x4   :  { %s234_s18 = scalar_lea.hbm %s377_s0, 64 }
   0x5   :  { %p235_p0 = scmp.ne.s32.totalorder %s377_s0, %s234_s18  ;;  %p238_p1 = scmp.lt.u32.totalorder %s234_s18, %s377_s0 }
   0x7   :  { %p240_p2 = pnand %p238_p1, %p235_p0 }
   0x9   :  { %243 = shalt.err (!%p240_p2)
}
   0xa   :  { %s244_s23 = scalar_lea.vmem %s18_s13, 64  ;;  %p249_p4 = scmp.lt.s32.totalorder %s18_s13, %s18_s13 }
   0xb   :  { %p245_p3 = scmp.ne.s32.totalorder %s18_s13, %s244_s23  ;;  %p250_p5 = scmp.lt.s32.totalorder %s244_s23, %s244_s23 }
   0xd   :  { %p251_p6 = por %p250_p5, %p249_p4 }
   0xf   :  { %p252_p7 = pnand %p251_p6, %p245_p3 }
  0x11   :  { %255 = shalt.err (!%p252_p7)
}
  0x12   :  { %20 = dma.hbm_to_vmem [thread:$0]  %s377_s0, 64, %s18_s13, [#allocation3]  }
  0x13   :  { %s256_s28 = scalar_lea.hbm %s378_s1, 4096 }
  0x14   :  { %p257_p8 = scmp.ne.s32.totalorder %s378_s1, %s256_s28  ;;  %p260_p9 = scmp.lt.u32.totalorder %s256_s28, %s378_s1 }
  0x16   :  { %p262_p10 = pnand %p260_p9, %p257_p8 }
  0x18   :  { %265 = shalt.err (!%p262_p10)
}
  0x19   :  { %s266_s6 = scalar_lea.vmem %s331_s15, 4096  ;;  %p271_p12 = scmp.lt.s32.totalorder %s331_s15, %s331_s15 }
  0x1a   :  { %p267_p11 = scmp.ne.s32.totalorder %s331_s15, %s266_s6  ;;  %p272_p13 = scmp.lt.s32.totalorder %s266_s6, %s266_s6 }
  0x1c   :  { %p273_p0 = por %p272_p13, %p271_p12 }
  0x1e   :  { %p274_p1 = pnand %p273_p0, %p267_p11 }
  0x20   :  { %277 = shalt.err (!%p274_p1)
}
  0x21   :  { %s308_s0 = smov 256   ;;  %s309_s7 = smov 16  }
  0x22   :  { %32 = dma.hbm_to_vmem [thread:$0]  %s378_s1, 4096, %s331_s15, [#allocation6], %s308_s0, %s308_s0, %s309_s7  }
  0x23   :  { %300 = dma.done.wait [#allocation3], 64  }
  0x24   :  { %301 = vsyncadd [#allocation3], 4294967232 }
  0x25   :  { %302 = dma.done.wait [#allocation6], 4096  }
  0x26   :  { %303 = vsyncadd [#allocation6], 4294963200  ;;  %v43_v0 = vld [vmem:[#allocation5 + $0x8] sm:$0xff]  ;;  %v45_v1 = vld [vmem:[#allocation5 + $0x18] sm:$0xff]  ;;  %vm162_vm0 = vcmask 1041408   ;;  %s310_s11 = smov [#allocation7]  }
  0x27   :  { %v42_v2 = vld [vmem:[#allocation5] sm:$0xff]  ;;  %v193_v3 = vpack.c.bf16 %v45_v1, %v43_v0  ;;  %v44_v4 = vld [vmem:[#allocation5 + $0x10] sm:$0xff]  ;;  %v47_v5 = vld [vmem:[#allocation5 + $0x28] sm:$0xff]  ;;  %s181_s12 = sshll.u32 %s310_s11, 4  ;;  %s182_s12 = int_to_ptr.vmem [resolvable:$true] %s181_s12 }
  0x28   :  { %v49_v6 = vld [vmem:[#allocation5 + $0x38] sm:$0xff]  ;;  %v195_v7 = vpack.c.bf16 %v44_v4, %v42_v2  ;;  %v46_v9 = vld [vmem:[#allocation5 + $0x20] sm:$0xff]  ;;  %v48_v10 = vld [vmem:[#allocation5 + $0x30] sm:$0xff]  ;;  %p283_p3 = scmp.lt.s32.totalorder %s182_s12, %s182_s12 }
  0x29   :  { %v197_v8 = vpack.c.bf16 %v49_v6, %v47_v5  ;;  %194 = vmatprep.subr.bf16.mxu0 %v193_v3  ;;  %v51_v11 = vld [vmem:[#allocation5 + $0x48] sm:$0xff]  ;;  %v53_v12 = vld [vmem:[#allocation5 + $0x58] sm:$0xff]  ;;  %v199_v13 = vpack.c.bf16 %v48_v10, %v46_v9  ;;  %v50_v17 = vld [vmem:[#allocation5 + $0x40] sm:$0xff] }
  0x2a   :  { %196 = vmatpush1.bf16.xpose.msra.mxu0 %v195_v7  ;;  %v201_v14 = vpack.c.bf16 %v53_v12, %v51_v11  ;;  %v192_v15 = vld.sshfl [vmem:[#allocation2] sm:$0x33 pattern:$0x76325410]  ;;  %v52_v18 = vld [vmem:[#allocation5 + $0x50] sm:$0xff]  ;;  %v55_v19 = vld [vmem:[#allocation5 + $0x68] sm:$0xff] }
  0x2b   :  { %198 = vmatprep.subr.bf16.mxu0 %v197_v8  ;;  %v89_v16 = vcombine.high %v192_v15, %v192_v15  ;;  %v57_v20 = vld [vmem:[#allocation5 + $0x78] sm:$0xff]  ;;  %v203_v21 = vpack.c.bf16 %v52_v18, %v50_v17  ;;  %v54_v23 = vld [vmem:[#allocation5 + $0x60] sm:$0xff]  ;;  %v56_v24 = vld [vmem:[#allocation5 + $0x70] sm:$0xff] }
  0x2c   :  { %v205_v22 = vpack.c.bf16 %v57_v20, %v55_v19  ;;  %v59_v25 = vld [vmem:[#allocation5 + $0x88] sm:$0xff]  ;;  %v61_v26 = vld [vmem:[#allocation5 + $0x98] sm:$0xff]  ;;  %v207_v27 = vpack.c.bf16 %v56_v24, %v54_v23  ;;  %v58_v29 = vld [vmem:[#allocation5 + $0x80] sm:$0xff] }
  0x2d   :  { %156 = vmatprep.mubr.f32.mxu0 %v89_v16  ;;  %v209_v28 = vpack.c.bf16 %v61_v26, %v59_v25  ;;  %v60_v30 = vld [vmem:[#allocation5 + $0x90] sm:$0xff]  ;;  %v63_v31 = vld [vmem:[#allocation5 + $0xa8] sm:$0xff]  ;;  %v65_v32 = vld [vmem:[#allocation5 + $0xb8] sm:$0xff] }
  0x2e   :  { %v211_v33 = vpack.c.bf16 %v60_v30, %v58_v29  ;;  %v213_v34 = vpack.c.bf16 %v65_v32, %v63_v31  ;;  %v62_v35 = vld [vmem:[#allocation5 + $0xa0] sm:$0xff]  ;;  %v64_v36 = vld [vmem:[#allocation5 + $0xb0] sm:$0xff]  ;;  %v67_v37 = vld [vmem:[#allocation5 + $0xc8] sm:$0xff] }
  0x2f   :  { %v69_v38 = vld [vmem:[#allocation5 + $0xd8] sm:$0xff]  ;;  %v215_v39 = vpack.c.bf16 %v64_v36, %v62_v35  ;;  %v66_v41 = vld [vmem:[#allocation5 + $0xc0] sm:$0xff]  ;;  %v68_v42 = vld [vmem:[#allocation5 + $0xd0] sm:$0xff] }
  0x30   :  { %v217_v40 = vpack.c.bf16 %v69_v38, %v67_v37  ;;  %v71_v43 = vld [vmem:[#allocation5 + $0xe8] sm:$0xff]  ;;  %v73_v44 = vld [vmem:[#allocation5 + $0xf8] sm:$0xff]  ;;  %v219_v45 = vpack.c.bf16 %v68_v42, %v66_v41  ;;  %v70_v47 = vld [vmem:[#allocation5 + $0xe0] sm:$0xff] }
  0x31   :  { %v221_v46 = vpack.c.bf16 %v73_v44, %v71_v43  ;;  %v72_v48 = vld [vmem:[#allocation5 + $0xf0] sm:$0xff]  ;;  %v191_v50 = vld [vmem:[%s379_s2] ss:$0 sm:$0xff]  ;;  %s278_s2 = scalar_lea.vmem %s182_s12, 32 }
  0x32   :  { %200 = vmatpush1.bf16.xpose.msra.mxu0 %v199_v13  ;;  %v223_v49 = vpack.c.bf16 %v72_v48, %v70_v47  ;;  %p279_p2 = scmp.ne.s32.totalorder %s182_s12, %s278_s2  ;;  %p284_p4 = scmp.lt.s32.totalorder %s278_s2, %s278_s2 }
  0x33   :  { %202 = vmatprep.subr.bf16.mxu0 %v201_v14 }
  0x34   :  { %p285_p5 = por %p284_p4, %p283_p3 }
  0x36   :  { %p286_p6 = pnand %p285_p5, %p279_p2 }
  0x3a   :  { %204 = vmatpush1.bf16.xpose.msra.mxu0 %v203_v21 }
  0x3b   :  { %206 = vmatprep.subr.bf16.mxu0 %v205_v22 }
  0x42   :  { %208 = vmatpush1.bf16.xpose.msra.mxu0 %v207_v27 }
  0x43   :  { %210 = vmatprep.subr.bf16.mxu0 %v209_v28 }
  0x4a   :  { %212 = vmatpush1.bf16.xpose.msra.mxu0 %v211_v33 }
  0x4b   :  { %214 = vmatprep.subr.bf16.mxu0 %v213_v34 }
  0x52   :  { %216 = vmatpush1.bf16.xpose.msra.mxu0 %v215_v39 }
  0x53   :  { %218 = vmatprep.subr.bf16.mxu0 %v217_v40 }
  0x5a   :  { %220 = vmatpush1.bf16.xpose.msra.mxu0 %v219_v45 }
  0x5b   :  { %222 = vmatprep.subr.bf16.mxu0 %v221_v46 }
  0x62   :  { %224 = vmatpush1.bf16.xpose.msra.mxu0 %v223_v49 }
  0x69   :  { %157 = vmatmul.mubr.f32.vlgmr.msra.gmra.mrb[0].mxu0 %v192_v15 }
 0x13c   :  { %v158_v51 = vpop.f32.mrb[0].mxu0 }
 0x13d   :  { %v159_v52 = vadd.f32 %v191_v50, %v158_v51  ;;  %v160_v53 = vpop.f32.mrb[1].mxu0 }
 0x13f   :  { %v163_v54 = vsel %vm162_vm0, %v159_v52, -inf }
 0x140   :  { %164 = vmax.xlane.f32.xlu0 %v163_v54 }
 0x1cd   :  { %v165_v55 = vpop.xlane.xlu0 %164 }
 0x1ce   :  { %v166_v56 = vsub.f32 %v159_v52, %v165_v55 }
 0x1d0   :  { %v167_v57 = vmul.f32 1.442695, %v166_v56 }
 0x1d2   :  { %230 = vpow2.f32 %v167_v57 }
 0x1dc   :  { %v231_v58 = vpop.eup %230 }
 0x1dd   :  { %v169_v59 = vsel %vm162_vm0, %v231_v58, 0.0 }
 0x1de   :  { %170 = vadd.xlane.f32.xlu0 %v169_v59 }
 0x26b   :  { %v171_v60 = vpop.xlane.xlu0 %170 }
 0x26c   :  { %232 = vrcp.f32 %v171_v60 }
 0x276   :  { %v233_v61 = vpop.eup %232 }
 0x277   :  { %v173_v62 = vmul.f32 %v233_v61, %v231_v58 }
 0x279   :  { %174 = vst [vmem:[#allocation7] sm:$0x3] %v173_v62 }
 0x27a   :  { %289 = shalt.err (!%p286_p6)
}
 0x27b   :  { %s290_s15 = scalar_lea.hbm %s380_s3, 32 }
 0x27c   :  { %p291_p7 = scmp.ne.s32.totalorder %s380_s3, %s290_s15  ;;  %p294_p8 = scmp.lt.u32.totalorder %s290_s15, %s380_s3 }
 0x27e   :  { %p296_p9 = pnand %p294_p8, %p291_p7 }
 0x280   :  { %299 = shalt.err (!%p296_p9)
}
 0x281   :  { %184 = dma.vmem_to_hbm [thread:$0]  %s182_s12, 32, %s380_s3, [#allocation4]  }
 0x282   :  { %304 = dma.done.wait [#allocation4], 32  }
 0x283   :  { %305 = vsyncadd [#allocation4], 4294967264 }
 0x284   :  { %188 = vsyncpa [#allocation3], 1 }
 0x285   :  { %189 = vsyncpa [#allocation6], 1 }
 0x286   :  { %190 = vsyncpa [#allocation4], 1 }

</bundles_post_ra>
